<compile_context>
chip_gen: v5e
topology: v5e:2x2
jax: 0.10.0
libtpu: 0.0.40
codegen_flags: <defaults>
</compile_context>

<pallas_src>
import functools

import jax
import jax.numpy as jnp
import numpy as np
from jax.experimental import pallas as pl
from jax.experimental.pallas import tpu as pltpu


def _round_up(x, m):
    return (x + m - 1) // m * m


def _vmem_capacity_bytes():
    """Trace-time VMEM capacity query; conservative 64 MiB (v7x) fallback."""
    try:
        cap = getattr(pltpu.get_tpu_info(), "vmem_capacity_bytes", None)
        if cap:
            return int(cap)
    except Exception:
        pass
    return 64 * 2 ** 20


def _vmem_need_bytes(tt, ht, D, out_itemsize):
    return (2 * tt * D * 2                # x tile, bf16, double-buffered
            + 12 * ht * D                 # W13 (D,2ht)+W2 (ht,D), bf16, double-buffered
            + 2 * tt * 4                  # routing column
            + 2 * tt * D * out_itemsize   # output tile, double-buffered
            + tt * D * 4)                 # f32 accumulator scratch


def choose_h_tile(D, H, vmem_cap=None):
    vmem_cap = vmem_cap or _vmem_capacity_bytes()
    ht = min(_round_up(H, 128), 512)
    # Keep the double-buffered weight chunks well under half of VMEM.
    while 12 * ht * D > 0.4 * vmem_cap and ht > 128:
        ht = max(128, ht // 2)
    return ht


def choose_token_tile(T, D, ht, out_itemsize, vmem_cap=None):
    vmem_cap = vmem_cap or _vmem_capacity_bytes()
    big_vmem = vmem_cap >= 100 * 2 ** 20            # v5e / v6e (128 MiB VMEM)
    cap = (96 if big_vmem else 52) * 2 ** 20        # v7x: stay well under 64 MiB
    # Big token tiles amortize weight streaming; never split tokens just to
    # create extra tiles, never below 16 rows (bf16 sublane packing).
    tt = min(512 if big_vmem else 256, _round_up(max(T, 16), 16))
    while _vmem_need_bytes(tt, ht, D, out_itemsize) > cap and tt > 16:
        tt = max(16, _round_up(tt // 2, 16))
    return tt, cap


# ----------------------------- Pallas kernel ------------------------------- #
def moe_expert_kernel(ids_ref, nact_ref, x_ref, w13_ref, w2_ref, rw_ref,
                      out_ref, acc_ref):
    """Grid = (token_tiles, h_chunks, expert_slots).

    Expert slots are innermost; padded slots repeat the previous expert id so
    their weight/routing block indices equal the previous step's and the DMA
    is elided.  acc_ref (VMEM f32) accumulates the weighted expert outputs for
    the resident token tile; the HBM output tile is written exactly once.
    """
    t = pl.program_id(0)
    h = pl.program_id(1)
    e = pl.program_id(2)
    n_h = pl.num_programs(1)
    n_e = pl.num_programs(2)

    @pl.when(jnp.logical_and(h == 0, e == 0))
    def _():
        acc_ref[...] = jnp.zeros_like(acc_ref)

    # Only the first nact[t] slots hold distinct active experts for this tile.
    @pl.when(e < nact_ref[t])
    def _():
        x = x_ref[...]                                            # (tt, D) bf16
        gu = jnp.dot(x, w13_ref[...],
                     preferred_element_type=jnp.float32)          # (tt, 2*ht) f32
        ht = gu.shape[-1] // 2
        g = gu[:, :ht]
        u = gu[:, ht:]
        # SiLU(g) * u with the routing weight folded in while still f32 and
        # only ht wide (cheaper than scaling the (tt, D) output every step).
        hid = (g * jax.nn.sigmoid(g)) * u * rw_ref[...]           # (tt, ht) f32
        acc_ref[...] += jnp.dot(hid.astype(x.dtype), w2_ref[...],
                                preferred_element_type=jnp.float32)

    @pl.when(jnp.logical_and(h == n_h - 1, e == n_e - 1))
    def _():
        out_ref[...] = acc_ref[...].astype(out_ref.dtype)


# ------------------------- one-time weight relayout ------------------------- #
def prepare_moe_weights(w1, w3, w2, *, h_tile=None):
    """Hoisted out of the forward path: pad H, cast bf16, fuse W1/W3 per h-chunk.

    w1/w3: (E, D, H) pre-transposed nn.Linear weights; w2: (E, H, D).
    Returns:
      w13: (E, n_h, D, 2*ht) bf16   fused gate/up projection per h-chunk
      w2r: (E, n_h, ht, D)   bf16
    """
    E, D, H = w1.shape
    ht = h_tile or choose_h_tile(D, H)
    H_pad = _round_up(H, ht)
    n_h = H_pad // ht

    def pad_h(w, axis):
        if H_pad == H:
            return w
        pad = [(0, 0)] * w.ndim
        pad[axis] = (0, H_pad - H)
        return jnp.pad(w, pad)

    w1r = pad_h(w1, 2).astype(jnp.bfloat16).reshape(E, D, n_h, ht).transpose(0, 2, 1, 3)
    w3r = pad_h(w3, 2).astype(jnp.bfloat16).reshape(E, D, n_h, ht).transpose(0, 2, 1, 3)
    w13 = jnp.concatenate([w1r, w3r], axis=-1)                    # (E, n_h, D, 2*ht)
    w2r = pad_h(w2, 1).astype(jnp.bfloat16).reshape(E, n_h, ht, D)
    return w13, w2r


# ------------------------------ kernel wrapper ------------------------------ #
def moe_block_pallas(x_flat, w13, w2r, rw_dense, *, token_tile=None):
    """x_flat: (T, D); w13: (E, n_h, D, 2*ht); w2r: (E, n_h, ht, D);
    rw_dense: (T, E) dense routing weights (0 for not-routed tokens)."""
    T, D = x_flat.shape
    E, n_h, _, two_ht = w13.shape
    ht = two_ht // 2
    out_dtype = x_flat.dtype
    # TODO(synk): if the consumer accepts bf16, emit bf16 output to halve writeback.

    vmem_cap = _vmem_capacity_bytes()
    tt, cap = choose_token_tile(T, D, ht, out_dtype.itemsize, vmem_cap)
    if token_tile is not None:
        tt = token_tile
    T_pad = _round_up(T, tt)
    n_t = T_pad // tt

    # bf16 activations (f32 accumulation in-kernel), zero-padded to T_pad.
    x_p = jnp.zeros((T_pad, D), jnp.bfloat16).at[:T].set(x_flat.astype(jnp.bfloat16))

    # Dense per-expert routing columns, (E, T_pad, 1) f32 (0 => not routed).
    rw_pad = jnp.zeros((T_pad, E), jnp.float32).at[:T].set(rw_dense.astype(jnp.float32))
    rw = rw_pad.T.reshape(E, T_pad, 1)

    # Compacted per-tile active-expert table (scalar-prefetched into SMEM).
    # ids[t, :nact[t]] = active expert indices (ascending); unused slots repeat
    # the last active id so padded grid steps reuse the same weight block and
    # their DMA is elided; pl.when(e < nact[t]) skips the compute.
    active = (rw_pad != 0).reshape(n_t, tt, E).any(axis=1)            # (n_t, E)
    nact = active.sum(axis=1).astype(jnp.int32)                       # (n_t,)
    slot = jnp.arange(E, dtype=jnp.int32)
    order = jnp.argsort(jnp.where(active, slot[None, :], E + slot[None, :]),
                        axis=1).astype(jnp.int32)                     # active first
    last = order[jnp.arange(n_t), jnp.maximum(nact - 1, 0)]           # (n_t,)
    ids = jnp.where(slot[None, :] < nact[:, None], order, last[:, None])
    ids_flat = ids.reshape(-1).astype(jnp.int32)                      # (n_t * E,)

    vmem_limit = int(min(cap, max(
        32 * 2 ** 20,
        int(1.25 * _vmem_need_bytes(tt, ht, D, out_dtype.itemsize)))))

    # TODO(synk): on v6e, pipeline_mode=pl.Buffered(3) on the weight specs can
    # hide exposed DMA behind skipped steps (needs ht<=256 to fit v7x VMEM).
    out = pl.pallas_call(
        moe_expert_kernel,
        out_shape=jax.ShapeDtypeStruct((T_pad, D), out_dtype),
        grid_spec=pltpu.PrefetchScalarGridSpec(
            num_scalar_prefetch=2,
            grid=(n_t, n_h, E),
            in_specs=[
                pl.BlockSpec((tt, D), lambda t, h, e, ids, na: (t, 0)),   # x tile
                pl.BlockSpec((pl.Squeezed(), pl.Squeezed(), D, 2 * ht),   # W13 chunk
                             lambda t, h, e, ids, na: (ids[t * E + e], h, 0, 0)),
                pl.BlockSpec((pl.Squeezed(), pl.Squeezed(), ht, D),       # W2 chunk
                             lambda t, h, e, ids, na: (ids[t * E + e], h, 0, 0)),
                pl.BlockSpec((pl.Squeezed(), tt, 1),                      # routing col
                             lambda t, h, e, ids, na: (ids[t * E + e], t, 0)),
            ],
            out_specs=pl.BlockSpec((tt, D), lambda t, h, e, ids, na: (t, 0)),
            scratch_shapes=[pltpu.VMEM((tt, D), jnp.float32)],
        ),
        compiler_params=pltpu.CompilerParams(
            dimension_semantics=("parallel", "arbitrary", "arbitrary"),
            vmem_limit_bytes=vmem_limit),
    )(ids_flat, nact, x_p, w13, w2r, rw)

    return out[:T]


# ------------------------------ routing glue -------------------------------- #
def compute_routing_weights(x_flat, gate_w, top_k, num_experts):
    """Matches: softmax(float32) -> top-k -> renormalize -> cast; densified (T, E)."""
    # TODO(synk): lax.top_k tie-breaking may differ from torch.topk on exact ties.
    T = x_flat.shape[0]
    logits = x_flat @ gate_w.T                                        # (T, E)
    probs = jax.nn.softmax(logits.astype(jnp.float32), axis=-1)
    top_vals, top_idx = jax.lax.top_k(probs, top_k)
    top_vals = top_vals / jnp.sum(top_vals, axis=-1, keepdims=True)
    top_vals = top_vals.astype(x_flat.dtype)
    rw_dense = jnp.zeros((T, num_experts), dtype=x_flat.dtype)
    rw_dense = rw_dense.at[jnp.arange(T)[:, None], top_idx].set(top_vals)
    return rw_dense


@functools.partial(jax.jit, static_argnums=(4, 5))
def moe_forward(x, gate_w, w13, w2r, top_k, num_experts):
    origin_shape = x.shape
    x_flat = x.reshape(-1, origin_shape[-1])
    rw_dense = compute_routing_weights(x_flat, gate_w, top_k, num_experts)
    out_flat = moe_block_pallas(x_flat, w13, w2r, rw_dense)
    return out_flat.reshape(origin_shape)


# ------------------------------ JAX reference ------------------------------- #
def moe_reference(x, gate_w, w1, w3, w2, top_k, num_experts):
    """Mirrors the kernel's dtype path (bf16 operands, f32 accumulation,
    routing weight folded into the hidden activations)."""
    origin_shape = x.shape
    x_flat = x.reshape(-1, origin_shape[-1])
    rw_dense = compute_routing_weights(x_flat, gate_w, top_k, num_experts)
    xb = x_flat.astype(jnp.bfloat16)
    out = jnp.zeros(x_flat.shape, jnp.float32)
    for e in range(num_experts):
        g = jnp.dot(xb, w1[e].astype(jnp.bfloat16), preferred_element_type=jnp.float32)
        u = jnp.dot(xb, w3[e].astype(jnp.bfloat16), preferred_element_type=jnp.float32)
        hid = (g * jax.nn.sigmoid(g)) * u * rw_dense[:, e:e + 1].astype(jnp.float32)
        y = jnp.dot(hid.astype(jnp.bfloat16), w2[e].astype(jnp.bfloat16),
                    preferred_element_type=jnp.float32)
        out = out + y
    return out.astype(x.dtype).reshape(origin_shape)


# ---------------------------------- main ------------------------------------ #
if __name__ == "__main__":
    key = jax.random.PRNGKey(0)
    B, S = 2, 8                       # 16 tokens total
    ffn_dim, hidden_dim = 128, 256    # model dim / MLP intermediate dim
    num_experts, top_k = 4, 2

    k0, k1, k2, k3, k4 = jax.random.split(key, 5)
    x = jax.random.normal(k0, (B, S, ffn_dim), jnp.float32)
    # Deterministic synthetic parameters (nn.Linear weights, stored transposed).
    gate_w = 0.05 * jax.random.normal(k1, (num_experts, ffn_dim), jnp.float32)
    w1 = 0.05 * jax.random.normal(k2, (num_experts, ffn_dim, hidden_dim), jnp.float32)
    w3 = 0.05 * jax.random.normal(k3, (num_experts, ffn_dim, hidden_dim), jnp.float32)
    w2 = 0.05 * jax.random.normal(k4, (num_experts, hidden_dim, ffn_dim), jnp.float32)

    # One-time weight relayout (hoisted out of the forward path).
    w13, w2r = prepare_moe_weights(w1, w3, w2)

    out = moe_forward(x, gate_w, w13, w2r, top_k, num_experts)
    jax.block_until_ready(out)

    ref = moe_reference(x, gate_w, w1, w3, w2, top_k, num_experts)
    np.testing.assert_allclose(np.asarray(out, np.float32),
                               np.asarray(ref, np.float32),
                               atol=1e-2, rtol=1e-2)
    print("KERNEL_OK")
</pallas_src>

<mosaic_0001>
module attributes {stable_mosaic.version = 11 : i64} {
  func.func @moe_expert_kernel(%arg0: i32, %arg1: i32, %arg2: i32, %arg3: memref<4xi32, #tpu.memory_space<smem>>, %arg4: memref<1xi32, #tpu.memory_space<smem>>, %arg5: memref<16x128xbf16, #tpu.memory_space<vmem>>, %arg6: memref<1x1x128x512xbf16, #tpu.memory_space<vmem>>, %arg7: memref<1x1x256x128xbf16, #tpu.memory_space<vmem>>, %arg8: memref<1x16x1xf32, #tpu.memory_space<vmem>>, %arg9: memref<16x128xf32, #tpu.memory_space<vmem>>, %arg10: memref<16x128xf32, #tpu.memory_space<vmem>>) attributes {dimension_semantics = [#tpu.dimension_semantics<parallel>, #tpu.dimension_semantics<arbitrary>, #tpu.dimension_semantics<arbitrary>], iteration_bounds = array<i64: 1, 1, 4>, scalar_prefetch = 2 : i64, scratch_operands = 1 : i64, tpu.core_type = #tpu.core_type<tc>, window_params = [{transform_indices = @transform_0, window_bounds = array<i64: 16, 128>}, {transform_indices = @transform_1, window_bounds = array<i64: 1, 1, 128, 512>}, {transform_indices = @transform_2, window_bounds = array<i64: 1, 1, 256, 128>}, {transform_indices = @transform_3, window_bounds = array<i64: 1, 16, 1>}, {transform_indices = @transform_4, window_bounds = array<i64: 16, 128>}]} {
    %c0_i32 = arith.constant 0 : i32
    %0 = arith.cmpi eq, %arg1, %c0_i32 : i32
    %c0_i32_0 = arith.constant 0 : i32
    %1 = arith.cmpi eq, %arg2, %c0_i32_0 : i32
    %2 = arith.andi %0, %1 : i1
    %3 = arith.extui %2 : i1 to i32
    %c0_i32_1 = arith.constant 0 : i32
    %4 = arith.cmpi ne, %3, %c0_i32_1 : i32
    scf.if %4 {
      %cst = arith.constant 0.000000e+00 : f32
      %15 = vector.broadcast %cst : f32 to vector<16x128xf32>
      %c0 = arith.constant 0 : index
      %c0_5 = arith.constant 0 : index
      %16 = vector.load %arg10[%c0, %c0_5] : memref<16x128xf32, #tpu.memory_space<vmem>>, vector<16x128xf32>
      tpu.vector_store %arg10[%c0, %c0_5], %15 {strides = array<i32>} : memref<16x128xf32, #tpu.memory_space<vmem>>, vector<16x128xf32>,
    } else {
    }
    %5 = arith.index_cast %arg0 : i32 to index
    %6 = memref.load %arg4[%5] : memref<1xi32, #tpu.memory_space<smem>>
    %7 = arith.cmpi slt, %arg2, %6 : i32
    %8 = arith.extui %7 : i1 to i32
    %c0_i32_2 = arith.constant 0 : i32
    %9 = arith.cmpi ne, %8, %c0_i32_2 : i32
    scf.if %9 {
      %c0 = arith.constant 0 : index
      %c0_5 = arith.constant 0 : index
      %15 = vector.load %arg5[%c0, %c0_5] : memref<16x128xbf16, #tpu.memory_space<vmem>>, vector<16x128xbf16>
      %c0_6 = arith.constant 0 : index
      %c0_7 = arith.constant 0 : index
      %c0_8 = arith.constant 0 : index
      %c0_9 = arith.constant 0 : index
      %16 = vector.load %arg6[%c0_6, %c0_7, %c0_8, %c0_9] : memref<1x1x128x512xbf16, #tpu.memory_space<vmem>>, vector<1x1x128x512xbf16>
      %17 = vector.shape_cast %16 : vector<1x1x128x512xbf16> to vector<128x512xbf16>
      %cst = arith.constant dense<0.000000e+00> : vector<16x512xf32>
      %18 = tpu.matmul %15, %17, %cst {dimension_numbers = #tpu.dot_dimension_numbers<[1], [0], [0], [1], [0, 0, 1, 1], [], []>} : vector<16x128xbf16>, vector<128x512xbf16>, vector<16x512xf32> -> vector<16x512xf32>
      %19 = vector.extract_strided_slice %18 {offsets = [0, 0], sizes = [16, 256], strides = [1, 1]} : vector<16x512xf32> to vector<16x256xf32>
      %20 = vector.extract_strided_slice %18 {offsets = [0, 256], sizes = [16, 256], strides = [1, 1]} : vector<16x512xf32> to vector<16x256xf32>
      %21 = arith.negf %19 : vector<16x256xf32>
      %22 = math.exp %21 : vector<16x256xf32>
      %cst_10 = arith.constant 1.000000e+00 : f32
      %23 = vector.broadcast %cst_10 : f32 to vector<16x256xf32>
      %24 = arith.addf %23, %22 : vector<16x256xf32>
      %25 = arith.divf %23, %24 : vector<16x256xf32>
      %26 = arith.mulf %19, %25 : vector<16x256xf32>
      %27 = arith.mulf %26, %20 : vector<16x256xf32>
      %c0_11 = arith.constant 0 : index
      %c0_12 = arith.constant 0 : index
      %c0_13 = arith.constant 0 : index
      %28 = vector.load %arg8[%c0_11, %c0_12, %c0_13] : memref<1x16x1xf32, #tpu.memory_space<vmem>>, vector<1x16x1xf32>
      %29 = vector.shape_cast %28 : vector<1x16x1xf32> to vector<16x1xf32>
      %30 = vector.broadcast %29 : vector<16x1xf32> to vector<16x256xf32>
      %31 = arith.mulf %27, %30 : vector<16x256xf32>
      %c0_14 = arith.constant 0 : index
      %c0_15 = arith.constant 0 : index
      %32 = vector.load %arg10[%c0_14, %c0_15] : memref<16x128xf32, #tpu.memory_space<vmem>>, vector<16x128xf32>
      %33 = arith.truncf %31 : vector<16x256xf32> to vector<16x256xbf16>
      %c0_16 = arith.constant 0 : index
      %c0_17 = arith.constant 0 : index
      %c0_18 = arith.constant 0 : index
      %c0_19 = arith.constant 0 : index
      %34 = vector.load %arg7[%c0_16, %c0_17, %c0_18, %c0_19] : memref<1x1x256x128xbf16, #tpu.memory_space<vmem>>, vector<1x1x256x128xbf16>
      %35 = vector.shape_cast %34 : vector<1x1x256x128xbf16> to vector<256x128xbf16>
      %cst_20 = arith.constant dense<0.000000e+00> : vector<16x128xf32>
      %36 = tpu.matmul %33, %35, %cst_20 {dimension_numbers = #tpu.dot_dimension_numbers<[1], [0], [0], [1], [0, 0, 1, 1], [], []>} : vector<16x256xbf16>, vector<256x128xbf16>, vector<16x128xf32> -> vector<16x128xf32>
      %37 = arith.addf %32, %36 : vector<16x128xf32>
      %c0_21 = arith.constant 0 : index
      %c0_22 = arith.constant 0 : index
      %38 = vector.load %arg10[%c0_21, %c0_22] : memref<16x128xf32, #tpu.memory_space<vmem>>, vector<16x128xf32>
      tpu.vector_store %arg10[%c0_21, %c0_22], %37 {strides = array<i32>} : memref<16x128xf32, #tpu.memory_space<vmem>>, vector<16x128xf32>,
    } else {
    }
    %c0_i32_3 = arith.constant 0 : i32
    %10 = arith.cmpi eq, %arg1, %c0_i32_3 : i32
    %c3_i32 = arith.constant 3 : i32
    %11 = arith.cmpi eq, %arg2, %c3_i32 : i32
    %12 = arith.andi %10, %11 : i1
    %13 = arith.extui %12 : i1 to i32
    %c0_i32_4 = arith.constant 0 : i32
    %14 = arith.cmpi ne, %13, %c0_i32_4 : i32
    scf.if %14 {
      %c0 = arith.constant 0 : index
      %c0_5 = arith.constant 0 : index
      %15 = vector.load %arg10[%c0, %c0_5] : memref<16x128xf32, #tpu.memory_space<vmem>>, vector<16x128xf32>
      %c0_6 = arith.constant 0 : index
      %c0_7 = arith.constant 0 : index
      %16 = vector.load %arg9[%c0_6, %c0_7] : memref<16x128xf32, #tpu.memory_space<vmem>>, vector<16x128xf32>
      tpu.vector_store %arg9[%c0_6, %c0_7], %15 {strides = array<i32>} : memref<16x128xf32, #tpu.memory_space<vmem>>, vector<16x128xf32>,
    } else {
    }
    return
  }
  func.func @transform_0(%arg0: i32, %arg1: i32, %arg2: i32, %arg3: memref<4xi32, #tpu.memory_space<smem>>, %arg4: memref<1xi32, #tpu.memory_space<smem>>) -> (i32, i32) {
    %c0_i32 = arith.constant 0 : i32
    %c0_i32_0 = arith.constant 0 : i32
    return %arg0, %c0_i32 : i32, i32
  }
  func.func @transform_1(%arg0: i32, %arg1: i32, %arg2: i32, %arg3: memref<4xi32, #tpu.memory_space<smem>>, %arg4: memref<1xi32, #tpu.memory_space<smem>>) -> (i32, i32, i32, i32) {
    %c4_i32 = arith.constant 4 : i32
    %0 = arith.muli %arg0, %c4_i32 : i32
    %1 = arith.addi %0, %arg2 : i32
    %2 = arith.index_cast %1 : i32 to index
    %3 = memref.load %arg3[%2] : memref<4xi32, #tpu.memory_space<smem>>
    %c0_i32 = arith.constant 0 : i32
    %c0_i32_0 = arith.constant 0 : i32
    %c0_i32_1 = arith.constant 0 : i32
    return %3, %arg1, %c0_i32, %c0_i32_0 : i32, i32, i32, i32
  }
  func.func @transform_2(%arg0: i32, %arg1: i32, %arg2: i32, %arg3: memref<4xi32, #tpu.memory_space<smem>>, %arg4: memref<1xi32, #tpu.memory_space<smem>>) -> (i32, i32, i32, i32) {
    %c4_i32 = arith.constant 4 : i32
    %0 = arith.muli %arg0, %c4_i32 : i32
    %1 = arith.addi %0, %arg2 : i32
    %2 = arith.index_cast %1 : i32 to index
    %3 = memref.load %arg3[%2] : memref<4xi32, #tpu.memory_space<smem>>
    %c0_i32 = arith.constant 0 : i32
    %c0_i32_0 = arith.constant 0 : i32
    %c0_i32_1 = arith.constant 0 : i32
    return %3, %arg1, %c0_i32, %c0_i32_0 : i32, i32, i32, i32
  }
  func.func @transform_3(%arg0: i32, %arg1: i32, %arg2: i32, %arg3: memref<4xi32, #tpu.memory_space<smem>>, %arg4: memref<1xi32, #tpu.memory_space<smem>>) -> (i32, i32, i32) {
    %c4_i32 = arith.constant 4 : i32
    %0 = arith.muli %arg0, %c4_i32 : i32
    %1 = arith.addi %0, %arg2 : i32
    %2 = arith.index_cast %1 : i32 to index
    %3 = memref.load %arg3[%2] : memref<4xi32, #tpu.memory_space<smem>>
    %c0_i32 = arith.constant 0 : i32
    %c0_i32_0 = arith.constant 0 : i32
    return %3, %arg0, %c0_i32 : i32, i32, i32
  }
  func.func @transform_4(%arg0: i32, %arg1: i32, %arg2: i32, %arg3: memref<4xi32, #tpu.memory_space<smem>>, %arg4: memref<1xi32, #tpu.memory_space<smem>>) -> (i32, i32) {
    %c0_i32 = arith.constant 0 : i32
    %c0_i32_0 = arith.constant 0 : i32
    return %arg0, %c0_i32 : i32, i32
  }
}

</mosaic_0001>

<bundles_post_ra>
// kernel: moe_forward.1
= control target key start
LH: loop header
LB: loop body
LE: loop exit
PB: predicated region body
PF: predicated region fallthrough
CT: control target
= control target key end

     0   :  { %s1456_s26 = smov [#allocation4]   ;;  %s1668_s0 = inlined_call_operand.vmem [shape: s32[4], index: 0, kind: input, shape index: {}]   ;;  %s1669_s1 = inlined_call_operand.<no memory space> [shape: s32[1], index: 1, kind: input, shape index: {}]   ;;  %s1670_s2 = inlined_call_operand.vmem [shape: bf16[16,128], index: 2, kind: input, shape index: {}]   ;;  %s1671_s3 = inlined_call_operand.vmem [shape: bf16[4,1,128,512], index: 3, kind: input, shape index: {}]   ;;  %s1672_s4 = inlined_call_operand.vmem [shape: bf16[4,1,256,128], index: 4, kind: input, shape index: {}]   ;;  %s1673_s5 = inlined_call_operand.vmem [shape: f32[4,16,1], index: 5, kind: input, shape index: {}]   ;;  %s1674_s6 = inlined_call_operand.hbm [shape: f32[16,128], index: 6, kind: output, shape index: {}]  }
   0x1   :  { %s12_s23 = sshll.u32 %s1668_s0, 4  ;;  %16 = sst [smem:[#allocation5]] %s1669_s1  ;;  %s13_s23 = int_to_ptr.vmem [resolvable:$true] %s12_s23 }
   0x2   :  { %15 = dma.vmem_to_smem %s13_s23, 16, %s1456_s26, [#allocation3] }
   0x3   :  { %1438 = dma.done.wait [#allocation3], 16 }
   0x4   :  { %1439 = vsyncadd [#allocation3], 4294967280 }
   0x5   :  { %19 = sfence }
   0x6   :  { %20 = vsyncpa [#allocation7], 0  ;;  %s1503_s27 = smov 0   ;;  %s1505_s28 = smov 0  }
   0x7   :  { %s1507_s29 = smov 0  }
   0x8 LB: > { %s1061_s0 = sadd.s32 4294967295, %s1454_s29   ;;  %s38_s1 = sadd.s32 1, %s1450_s28  ;;  %s1454_s29 = sphi %s1507_s29, %s26_s29   ;;  %s1450_s28 = sphi %s1505_s28, %s1678_s28   ;;  %s1446_s27 = sphi %s1503_s27, %s1677_s27  }
   0x9   : > { %p39_p0 = scmp.ge.s32.totalorder %s38_s1, 4  ;;  %p1065_p1 = scmp.ge.s32.totalorder %s1454_s29, 1 }
   0xa   : > { %p279_p2 = scmp.lt.s32.totalorder %s1454_s29, 5 }
   0xb   : > { %s1680_s1 = smov (%p39_p0, %s38_s1), 0 }
   0xc   : > { %p280_p3 = pnand %p1065_p1, %p279_p2 }
   0xd   : > { %s344_s30 = sld [smem:[#allocation4 + %s1446_s27]] (!%p280_p3)  ;;  %p390_p4 = scmp.eq.s32.totalorder (!%p280_p3), %s1446_s27, 0 }
   0xe   : > { %283 = sbr.rel (%p280_p3) target bundleno = 403 (0x193), region = 36  ;;  %s359_s7 = sld [smem:[#allocation4 + %s1446_s27]] (!%p280_p3) }
   0xf   : > { %s374_s8 = sld [smem:[#allocation4 + %s1446_s27]] (!%p280_p3) }
  0x13   : > { %p345_p5 = scmp.lt.s32.totalorder %s344_s30, 3  ;;  %v1457_v0 = vmov (%p390_p4), 0.0  }
  0x14   : > { %p360_p6 = scmp.lt.s32.totalorder %s359_s7, 3  ;;  %395 = vst [vmem:[#allocation2] sm:$0xff] (%p390_p4), %v1457_v0 }
  0x15   : > { %s1682_s30 = smov (!%p345_p5, %s344_s30), 3  ;;  %p376_p7 = scmp.lt.s32.totalorder %s374_s8, 3  ;;  %396 = vst [vmem:[#allocation2 + $0x8] sm:$0xff] (%p390_p4), %v1457_v0 }
  0x16   : > { %s1684_s7 = smov (!%p360_p6, %s359_s7), 3  ;;  %s1279_s9 = sshll.u32 %s1682_s30, 8 }
  0x17   : > { %s1531_s12 = scalar_lea.vmem %s1671_s3, %s1279_s9  ;;  %s1280_s13 = sshll.u32 %s1684_s7, 7 }
  0x18   : > { %s1536_s16 = scalar_lea.vmem %s1672_s4, %s1280_s13  ;;  %s1686_s8 = smov (!%p376_p7, %s374_s8), 3 }
  0x19   : > { %s1281_s17 = sshll.u32 %s1686_s8, 4  ;;  %394 = sbr.rel (!%p390_p4) target bundleno = 30 (0x1e), region = 40 }
  0x1a   : > { %s1541_s20 = scalar_lea.vmem %s1673_s5, %s1281_s17 }
  0x1e PF: > { %s397_s21 = sld [smem:[#allocation5]] }
  0x24   : > { %p1073_p8 = scmp.ge.s32.totalorder %s1446_s27, %s397_s21 }
  0x26   : > { %401 = sbr.rel (%p1073_p8) target bundleno = 389 (0x185), region = 44 }
  0x2b   : > { %v1192_v1 = vld [vmem:[%s1531_s12 + $0xe0] sm:$0xf]  ;;  %v1314_v2 = vld [vmem:[%s1531_s12 + $0xec] sm:$0xf0]  ;;  %v1312_v3 = vld [vmem:[%s1531_s12 + $0xe4] sm:$0xf] }
  0x2c   : > { %v1193_v4 = vor.u32 %v1314_v2, %v1192_v1  ;;  %v1194_v5 = vld [vmem:[%s1531_s12 + $0xf0] sm:$0xf0]  ;;  %v1176_v6 = vld [vmem:[%s1531_s12 + $0xc0] sm:$0xf]  ;;  %v1310_v7 = vld [vmem:[%s1531_s12 + $0xcc] sm:$0xf0] }
  0x2d   : > { %v1197_v8 = vor.u32 %v1312_v3, %v1194_v5  ;;  %v1308_v9 = vld [vmem:[%s1531_s12 + $0xc4] sm:$0xf]  ;;  %v1178_v10 = vld [vmem:[%s1531_s12 + $0xd0] sm:$0xf0]  ;;  %v1177_v11 = vor.u32 %v1310_v7, %v1176_v6  ;;  %v1160_v13 = vld [vmem:[%s1531_s12 + $0xa0] sm:$0xf] }
  0x2e   : > { %602 = vmatpush.bf16.msra.mxu0 %v1193_v4  ;;  %v1181_v12 = vor.u32 %v1308_v9, %v1178_v10  ;;  %v1306_v14 = vld [vmem:[%s1531_s12 + $0xac] sm:$0xf0]  ;;  %v1304_v15 = vld [vmem:[%s1531_s12 + $0xa4] sm:$0xf]  ;;  %v1162_v16 = vld [vmem:[%s1531_s12 + $0xb0] sm:$0xf0] }
  0x2f   : > { %616 = vmatpush.bf16.msra.mxu1 %v1197_v8  ;;  %v1200_v17 = vld [vmem:[%s1531_s12 + $0xe8] sm:$0xf]  ;;  %v1161_v18 = vor.u32 %v1306_v14, %v1160_v13  ;;  %v1315_v19 = vld [vmem:[%s1531_s12 + $0xf4] sm:$0xf0]  ;;  %v1313_v20 = vld [vmem:[%s1531_s12 + $0xec] sm:$0xf]  ;;  %v1165_v22 = vor.u32 %v1304_v15, %v1162_v16 }
  0x30   : > { %v1202_v21 = vld [vmem:[%s1531_s12 + $0xf8] sm:$0xf0]  ;;  %v1144_v23 = vld [vmem:[%s1531_s12 + $0x80] sm:$0xf]  ;;  %v1302_v24 = vld [vmem:[%s1531_s12 + $0x8c] sm:$0xf0]  ;;  %v1201_v26 = vor.u32 %v1315_v19, %v1200_v17 }
  0x31   : > { %v1300_v25 = vld [vmem:[%s1531_s12 + $0x84] sm:$0xf]  ;;  %v1205_v27 = vor.u32 %v1313_v20, %v1202_v21  ;;  %v1146_v28 = vld [vmem:[%s1531_s12 + $0x90] sm:$0xf0]  ;;  %v1184_v29 = vld [vmem:[%s1531_s12 + $0xc8] sm:$0xf]  ;;  %v1145_v34 = vor.u32 %v1302_v24, %v1144_v23 }
  0x32   : > { %603 = vmatpush.bf16.msra.mxu0 %v1177_v11  ;;  %v1311_v30 = vld [vmem:[%s1531_s12 + $0xd4] sm:$0xf0]  ;;  %630 = vmatpush.bf16.msra.mxu2 %v1201_v26  ;;  %v1309_v32 = vld [vmem:[%s1531_s12 + $0xcc] sm:$0xf]  ;;  %v1186_v33 = vld [vmem:[%s1531_s12 + $0xd8] sm:$0xf0]  ;;  %v1149_v38 = vor.u32 %v1300_v25, %v1146_v28 }
  0x33   : > { %617 = vmatpush.bf16.msra.mxu1 %v1181_v12  ;;  %644 = vmatpush.bf16.msra.mxu3 %v1205_v27  ;;  %v1185_v31 = vor.u32 %v1311_v30, %v1184_v29  ;;  %v1128_v35 = vld [vmem:[%s1531_s12 + $0x60] sm:$0xf]  ;;  %v1298_v36 = vld [vmem:[%s1531_s12 + $0x6c] sm:$0xf0]  ;;  %v1189_v37 = vor.u32 %v1309_v32, %v1186_v33  ;;  %v1168_v39 = vld [vmem:[%s1531_s12 + $0xa8] sm:$0xf] }
  0x34   : > { %v1307_v40 = vld [vmem:[%s1531_s12 + $0xb4] sm:$0xf0]  ;;  %v1305_v41 = vld [vmem:[%s1531_s12 + $0xac] sm:$0xf]  ;;  %v1296_v42 = vld [vmem:[%s1531_s12 + $0x64] sm:$0xf]  ;;  %v1129_v48 = vor.u32 %v1298_v36, %v1128_v35 }
  0x35   : > { %v1130_v43 = vld [vmem:[%s1531_s12 + $0x70] sm:$0xf0]  ;;  %v1170_v44 = vld [vmem:[%s1531_s12 + $0xb8] sm:$0xf0]  ;;  %v1169_v45 = vor.u32 %v1307_v40, %v1168_v39  ;;  %v1152_v47 = vld [vmem:[%s1531_s12 + $0x88] sm:$0xf] }
  0x36   : > { %604 = vmatpush.bf16.msra.mxu0 %v1161_v18  ;;  %631 = vmatpush.bf16.msra.mxu2 %v1185_v31  ;;  %v1173_v46 = vor.u32 %v1305_v41, %v1170_v44  ;;  %v1303_v49 = vld [vmem:[%s1531_s12 + $0x94] sm:$0xf0]  ;;  %v1301_v50 = vld [vmem:[%s1531_s12 + $0x8c] sm:$0xf]  ;;  %v1154_v51 = vld [vmem:[%s1531_s12 + $0x98] sm:$0xf0]  ;;  %v1133_v52 = vor.u32 %v1296_v42, %v1130_v43 }
  0x37   : > { %618 = vmatpush.bf16.msra.mxu1 %v1165_v22  ;;  %645 = vmatpush.bf16.msra.mxu3 %v1189_v37  ;;  %v1112_v53 = vld [vmem:[%s1531_s12 + $0x40] sm:$0xf]  ;;  %v1294_v54 = vld [vmem:[%s1531_s12 + $0x4c] sm:$0xf0]  ;;  %v1292_v55 = vld [vmem:[%s1531_s12 + $0x44] sm:$0xf]  ;;  %v1153_v58 = vor.u32 %v1303_v49, %v1152_v47  ;;  %v1157_v59 = vor.u32 %v1301_v50, %v1154_v51 }
  0x38   : > { %v1114_v56 = vld [vmem:[%s1531_s12 + $0x50] sm:$0xf0]  ;;  %v1458_v57 = vmov 0   ;;  %v1136_v60 = vld [vmem:[%s1531_s12 + $0x68] sm:$0xf]  ;;  %v1113_v61 = vor.u32 %v1294_v54, %v1112_v53  ;;  %v742_v6 = vld [vmem:[%s1541_s20] sm:$0xff] }
  0x39   : > { %1369 = vset.pattern.permute.xlu0 %v1458_v57  ;;  %v1299_v62 = vld [vmem:[%s1531_s12 + $0x74] sm:$0xf0]  ;;  %v1297_v63 = vld [vmem:[%s1531_s12 + $0x6c] sm:$0xf]  ;;  %v1138_v0 = vld [vmem:[%s1531_s12 + $0x78] sm:$0xf0]  ;;  %v1117_v1 = vor.u32 %v1292_v55, %v1114_v56 }
  0x3a   : > { %605 = vmatpush.bf16.msra.mxu0 %v1145_v34  ;;  %632 = vmatpush.bf16.msra.mxu2 %v1169_v45  ;;  %v1096_v2 = vld [vmem:[%s1531_s12 + $0x20] sm:$0xf]  ;;  %v1290_v3 = vld [vmem:[%s1531_s12 + $0x2c] sm:$0xf0]  ;;  %v1288_v4 = vld [vmem:[%s1531_s12 + $0x24] sm:$0xf]  ;;  %v1137_v7 = vor.u32 %v1299_v62, %v1136_v60  ;;  %v1141_v8 = vor.u32 %v1297_v63, %v1138_v0 }
  0x3b   : > { %619 = vmatpush.bf16.msra.mxu1 %v1149_v38  ;;  %646 = vmatpush.bf16.msra.mxu3 %v1173_v46  ;;  %v1098_v5 = vld [vmem:[%s1531_s12 + $0x30] sm:$0xf0]  ;;  %v1120_v9 = vld [vmem:[%s1531_s12 + $0x48] sm:$0xf]  ;;  %v1097_v10 = vor.u32 %v1290_v3, %v1096_v2  ;;  %v1295_v11 = vld [vmem:[%s1531_s12 + $0x54] sm:$0xf0] }
  0x3c   : > { %v1293_v12 = vld [vmem:[%s1531_s12 + $0x4c] sm:$0xf]  ;;  %v1122_v13 = vld [vmem:[%s1531_s12 + $0x58] sm:$0xf0]  ;;  %746 = vperm.xlu0 %1369, %v742_v6   ;;  %v1101_v14 = vor.u32 %v1288_v4, %v1098_v5  ;;  %v1080_v15 = vld [vmem:[%s1531_s12] sm:$0xf]  ;;  %v1121_v19 = vor.u32 %v1295_v11, %v1120_v9 }
  0x3d   : > { %v1286_v16 = vld [vmem:[%s1531_s12 + $0xc] sm:$0xf0]  ;;  %v1284_v17 = vld [vmem:[%s1531_s12 + $0x4] sm:$0xf]  ;;  %v1082_v18 = vld [vmem:[%s1531_s12 + $0x10] sm:$0xf0]  ;;  %v1125_v20 = vor.u32 %v1293_v12, %v1122_v13 }
  0x3e   : > { %606 = vmatpush.bf16.msra.mxu0 %v1129_v48  ;;  %633 = vmatpush.bf16.msra.mxu2 %v1153_v58  ;;  %v1081_v21 = vor.u32 %v1286_v16, %v1080_v15  ;;  %v1104_v22 = vld [vmem:[%s1531_s12 + $0x28] sm:$0xf]  ;;  %v1291_v23 = vld [vmem:[%s1531_s12 + $0x34] sm:$0xf0]  ;;  %v1085_v24 = vor.u32 %v1284_v17, %v1082_v18  ;;  %v1289_v25 = vld [vmem:[%s1531_s12 + $0x2c] sm:$0xf] }
  0x3f   : > { %620 = vmatpush.bf16.msra.mxu1 %v1133_v52  ;;  %647 = vmatpush.bf16.msra.mxu3 %v1157_v59  ;;  %v1106_v26 = vld [vmem:[%s1531_s12 + $0x38] sm:$0xf0]  ;;  %v743_v27 = vld [vmem:[%s1541_s20 + $0x8] sm:$0xff]  ;;  %v1283_v28 = vld [vmem:[%s1670_s2] sm:$0xff]  ;;  %v1105_v29 = vor.u32 %v1291_v23, %v1104_v22 }
  0x40   : > { %v1109_v30 = vor.u32 %v1289_v25, %v1106_v26  ;;  %v1088_v31 = vld [vmem:[%s1531_s12 + $0x8] sm:$0xf]  ;;  %v1287_v32 = vld [vmem:[%s1531_s12 + $0x14] sm:$0xf0]  ;;  %v1285_v33 = vld [vmem:[%s1531_s12 + $0xc] sm:$0xf] }
  0x41   : > { %v1090_v34 = vld [vmem:[%s1531_s12 + $0x18] sm:$0xf0]  ;;  %v1089_v35 = vor.u32 %v1287_v32, %v1088_v31  ;;  %v1322_v39 = vld [vmem:[%s1536_s16 + $0x30] sm:$0xff]  ;;  %v1321_v41 = vld [vmem:[%s1536_s16 + $0x28] sm:$0xff] }
  0x42   : > { %607 = vmatpush.bf16.msra.mxu0 %v1113_v61  ;;  %634 = vmatpush.bf16.msra.mxu2 %v1137_v7  ;;  %v1093_v36 = vor.u32 %v1285_v33, %v1090_v34  ;;  %v1323_v37 = vld [vmem:[%s1536_s16 + $0x38] sm:$0xff]  ;;  %v1330_v40 = vld [vmem:[%s1536_s16 + $0x70] sm:$0xff]  ;;  %v1329_v42 = vld [vmem:[%s1536_s16 + $0x68] sm:$0xff] }
  0x43   : > { %621 = vmatpush.bf16.msra.mxu1 %v1117_v1  ;;  %648 = vmatpush.bf16.msra.mxu3 %v1141_v8  ;;  %v1331_v38 = vld [vmem:[%s1536_s16 + $0x78] sm:$0xff]  ;;  %v1320_v43 = vld [vmem:[%s1536_s16 + $0x20] sm:$0xff]  ;;  %v1318_v51 = vld [vmem:[%s1536_s16 + $0x10] sm:$0xff] }
  0x44   : > { %751 = vperm.xlu0 %1369, %v743_v27   ;;  %v1328_v44 = vld [vmem:[%s1536_s16 + $0x60] sm:$0xff]  ;;  %v1319_v46 = vld [vmem:[%s1536_s16 + $0x18] sm:$0xff]  ;;  %v1326_v52 = vld [vmem:[%s1536_s16 + $0x50] sm:$0xff] }
  0x45   : > { %v1327_v47 = vld [vmem:[%s1536_s16 + $0x58] sm:$0xff]  ;;  %v1317_v54 = vld [vmem:[%s1536_s16 + $0x8] sm:$0xff]  ;;  %v1316_v63 = vld [vmem:[%s1536_s16] sm:$0xff] }
  0x46   : > { %608 = vmatpush.bf16.msra.mxu0 %v1097_v10  ;;  %635 = vmatpush.bf16.msra.mxu2 %v1121_v19  ;;  %v1325_v55 = vld [vmem:[%s1536_s16 + $0x48] sm:$0xff]  ;;  %v1324_v0 = vld [vmem:[%s1536_s16 + $0x40] sm:$0xff] }
  0x47   : > { %622 = vmatpush.bf16.msra.mxu1 %v1101_v14  ;;  %649 = vmatpush.bf16.msra.mxu3 %v1125_v20 }
  0x4a   : > { %609 = vmatpush.bf16.msra.mxu0 %v1081_v21  ;;  %636 = vmatpush.bf16.msra.mxu2 %v1105_v29 }
  0x4b   : > { %623 = vmatpush.bf16.msra.mxu1 %v1085_v24  ;;  %650 = vmatpush.bf16.msra.mxu3 %v1109_v30 }
  0x4d   : > { %610 = vmatmul.bf16.vlgmr.msra.gmra.mxu0 %v1283_v28 }
  0x4e   : > { %624 = vmatmul.bf16.vlgmr.msra.gmra.mxu1 %v1283_v28  ;;  %637 = vmatpush.bf16.msra.mxu2 %v1089_v35 }
  0x4f   : > { %651 = vmatpush.bf16.msra.mxu3 %v1093_v36  ;;  %890 = vmatpush.bf16.msrb.mxu0 %v1323_v37 }
  0x50   : > { %904 = vmatpush.bf16.msrb.mxu1 %v1331_v38 }
  0x51   : > { %638 = vmatmul.bf16.vlgmr.msra.gmra.mxu2 %v1283_v28 }
  0x52   : > { %652 = vmatmul.bf16.vlgmr.msra.gmra.mxu3 %v1283_v28 }
  0x53   : > { %891 = vmatpush.bf16.msrb.mxu0 %v1322_v39 }
  0x54   : > { %905 = vmatpush.bf16.msrb.mxu1 %v1330_v40 }
  0x57   : > { %892 = vmatpush.bf16.msrb.mxu0 %v1321_v41 }
  0x58   : > { %906 = vmatpush.bf16.msrb.mxu1 %v1329_v42 }
  0x5b   : > { %893 = vmatpush.bf16.msrb.mxu0 %v1320_v43 }
  0x5c   : > { %907 = vmatpush.bf16.msrb.mxu1 %v1328_v44 }
  0x5f   : > { %894 = vmatpush.bf16.msrb.mxu0 %v1319_v46 }
  0x60   : > { %908 = vmatpush.bf16.msrb.mxu1 %v1327_v47 }
  0x63   : > { %895 = vmatpush.bf16.msrb.mxu0 %v1318_v51 }
  0x64   : > { %909 = vmatpush.bf16.msrb.mxu1 %v1326_v52 }
  0x67   : > { %896 = vmatpush.bf16.msrb.mxu0 %v1317_v54 }
  0x68   : > { %910 = vmatpush.bf16.msrb.mxu1 %v1325_v55 }
  0x6b   : > { %897 = vmatpush.bf16.msrb.mxu0 %v1316_v63 }
  0x6c   : > { %911 = vmatpush.bf16.msrb.mxu1 %v1324_v0 }
  0xae   : > { %v747_v31 = vpop.permute.xlu0 %746 }
  0xca   : > { %v1623_v45 = vpop.f32.mrf.mxu0 }
  0xcb   : > { %v1206_v48 = vmul.f32 -1.442695, %v1623_v45  ;;  %v1628_v49 = vpop.f32.mrf.mxu1 }
  0xcc   : > { %v1207_v50 = vmul.f32 -1.442695, %v1628_v49 }
  0xcd   : > { %1370 = vpow2.f32 %v1206_v48 }
  0xce   : > { %1372 = vpow2.f32 %v1207_v50 }
  0xd2   : > { %v1633_v53 = vpop.f32.mrf.mxu0 }
  0xd3   : > { %v1371_v56 = vpop.eup %1370  ;;  %v1208_v57 = vmul.f32 -1.442695, %v1633_v53  ;;  %v1638_v58 = vpop.f32.mrf.mxu1 }
  0xd4   : > { %v1373_v59 = vpop.eup %1372  ;;  %v670_v60 = vadd.f32 1.0, %v1371_v56  ;;  %v1209_v61 = vmul.f32 -1.442695, %v1638_v58  ;;  %v639_v23 = vpop.f32.mrf.mxu2 }
  0xd5   : > { %v671_v62 = vadd.f32 1.0, %v1373_v59  ;;  %1374 = vpow2.f32 %v1208_v57  ;;  %v653_v35 = vpop.f32.mrf.mxu3 }
  0xd6   : > { %1376 = vrcp.f32 %v670_v60  ;;  %v685_v12 = vand.u32 2147483648, %v670_v60  ;;  %vm679_vm1 = vweird.f32 %v670_v60  ;;  %v683_v15 = vand.u32 2147483647, %v670_v60 }
  0xd7   : > { %1378 = vrcp.f32 %v671_v62  ;;  %v700_v19 = vand.u32 2147483648, %v671_v62  ;;  %vm694_vm4 = vweird.f32 %v671_v62  ;;  %v698_v22 = vand.u32 2147483647, %v671_v62 }
  0xd8   : > { %1380 = vpow2.f32 %v1209_v61  ;;  %v686_v21 = vor.u32 1.1754944e-38, %v685_v12  ;;  %vm684_vm5 = vcmp.eq.f32.partialorder %v683_v15, 8.507059e+37 }
  0xd9   : > { %v701_v32 = vor.u32 1.1754944e-38, %v700_v19  ;;  %vm699_vm8 = vcmp.eq.f32.partialorder %v698_v22, 8.507059e+37 }
  0xdb   : > { %v1375_v1 = vpop.eup %1374 }
  0xdc   : > { %v1377_v2 = vpop.eup %1376  ;;  %v672_v3 = vadd.f32 1.0, %v1375_v1  ;;  %v641_v54 = vpop.f32.mrf.mxu2 }
  0xdd   : > { %v1379_v4 = vpop.eup %1378  ;;  %v675_v5 = vmul.f32 %v1377_v2, %v670_v60  ;;  %vm680_vm0 = vweird.f32 %v1377_v2  ;;  %v752_v60 = vpop.permute.xlu0 %751 }
  0xde   : > { %v1381_v6 = vpop.eup %1380  ;;  %v690_v7 = vmul.f32 %v1379_v4, %v671_v62  ;;  %1382 = vrcp.f32 %v672_v3  ;;  %vm681_vm2 = vmor %vm679_vm1, %vm680_vm0  ;;  %vm695_vm3 = vweird.f32 %v1379_v4  ;;  %v715_v29 = vand.u32 2147483648, %v672_v3  ;;  %v655_v62 = vpop.f32.mrf.mxu3 }
  0xdf   : > { %v676_v8 = vsub.f32 1.0, %v675_v5  ;;  %v673_v9 = vadd.f32 1.0, %v1381_v6  ;;  %vm1643_vm6 = vmor %vm694_vm4, %vm695_vm3  ;;  %v713_v34 = vand.u32 2147483647, %v672_v3  ;;  %vm709_vm9 = vweird.f32 %v672_v3 }
  0xe0   : > { %v691_v10 = vsub.f32 1.0, %v690_v7  ;;  %v716_v41 = vor.u32 1.1754944e-38, %v715_v29 }
  0xe1   : > { %v677_v11 = vmul.f32 %v1377_v2, %v676_v8  ;;  %1384 = vrcp.f32 %v673_v9  ;;  %v730_v40 = vand.u32 2147483648, %v673_v9  ;;  %v728_v43 = vand.u32 2147483647, %v673_v9 }
  0xe2   : > { %v692_v13 = vmul.f32 %v1379_v4, %v691_v10  ;;  %vm714_vm12 = vcmp.eq.f32.partialorder %v713_v34, 8.507059e+37  ;;  %vm724_vm13 = vweird.f32 %v673_v9 }
  0xe3   : > { %v678_v14 = vadd.f32 %v1377_v2, %v677_v11  ;;  %v731_v51 = vor.u32 1.1754944e-38, %v730_v40  ;;  %vm729_vm15 = vcmp.eq.f32.partialorder %v728_v43, 8.507059e+37 }
  0xe4   : > { %v1383_v16 = vpop.eup %1382  ;;  %v693_v17 = vadd.f32 %v1379_v4, %v692_v13 }
  0xe5   : > { %v682_v18 = vsel %vm681_vm2, %v1377_v2, %v678_v14  ;;  %v705_v20 = vmul.f32 %v1383_v16, %v672_v3  ;;  %vm710_vm7 = vweird.f32 %v1383_v16 }
  0xe6   : > { %v687_v27 = vsel %vm684_vm5, %v686_v21, %v682_v18  ;;  %v697_v28 = vsel %vm1643_vm6, %v1379_v4, %v693_v17  ;;  %vm711_vm10 = vmor %vm709_vm9, %vm710_vm7  ;;  %v758_v4 = vld [vmem:[#allocation2] sm:$0xff] }
  0xe7   : > { %v1385_v24 = vpop.eup %1384  ;;  %v706_v26 = vsub.f32 1.0, %v705_v20  ;;  %v734_v37 = vmul.f32 %v687_v27, %v1623_v45  ;;  %v702_v38 = vsel %vm699_vm8, %v701_v32, %v697_v28 }
  0xe8   : > { %v720_v30 = vmul.f32 %v1385_v24, %v673_v9  ;;  %vm725_vm11 = vweird.f32 %v1385_v24  ;;  %v735_v46 = vmul.f32 %v702_v38, %v1628_v49 }
  0xe9   : > { %v707_v33 = vmul.f32 %v1383_v16, %v706_v26  ;;  %vm726_vm14 = vmor %vm724_vm13, %vm725_vm11  ;;  %v738_v45 = vmul.f32 %v734_v37, %v639_v23 }
  0xea   : > { %v721_v36 = vsub.f32 1.0, %v720_v30  ;;  %v739_v59 = vmul.f32 %v735_v46, %v653_v35 }
  0xeb   : > { %v708_v39 = vadd.f32 %v1383_v16, %v707_v33  ;;  %v754_v61 = vmul.f32 %v747_v31, %v738_v45 }
  0xec   : > { %v722_v42 = vmul.f32 %v1385_v24, %v721_v36  ;;  %v755_v1 = vmul.f32 %v747_v31, %v739_v59 }
  0xed   : > { %v712_v44 = vsel %vm711_vm10, %v1383_v16, %v708_v39 }
  0xee   : > { %v717_v47 = vsel %vm714_vm12, %v716_v41, %v712_v44  ;;  %v723_v48 = vadd.f32 %v1385_v24, %v722_v42 }
  0xef   : > { %v736_v50 = vmul.f32 %v717_v47, %v1633_v53 }
  0xf0   : > { %v727_v52 = vsel %vm726_vm14, %v1385_v24, %v723_v48 }
  0xf1   : > { %v732_v55 = vsel %vm729_vm15, %v731_v51, %v727_v52  ;;  %v740_v56 = vmul.f32 %v736_v50, %v641_v54 }
  0xf2   : > { %v737_v57 = vmul.f32 %v732_v55, %v1638_v58  ;;  %v759_v58 = vld [vmem:[#allocation2 + $0x8] sm:$0xff] }
  0xf3   : > { %v756_v49 = vmul.f32 %v752_v60, %v740_v56 }
  0xf4   : > { %v741_v63 = vmul.f32 %v737_v57, %v655_v62 }
  0xf5   : > { %v760_v0 = vpack.c.bf16 %v756_v49, %v754_v61 }
  0xf6   : > { %v757_v2 = vmul.f32 %v752_v60, %v741_v63 }
  0xf7   : > { %898 = vmatmul.bf16.vlgmr.msrb.gmra.mxu0 %v760_v0 }
  0xf8   : > { %v761_v53 = vpack.c.bf16 %v757_v2, %v755_v1 }
  0xfa   : > { %912 = vmatmul.bf16.vlgmr.msrb.gmra.mxu1 %v761_v53 }
 0x174   : > { %v899_v3 = vpop.f32.mrf.mxu0 }
 0x177   : > { %v913_v5 = vpop.f32.mrf.mxu1 }
 0x178   : > { %v914_v6 = vadd.f32 %v913_v5, %v899_v3 }
 0x17a   : > { %v918_v7 = vadd.f32 %v914_v6, %v758_v4 }
 0x17c   : > { %920 = vst [vmem:[#allocation2] sm:$0xff] %v918_v7  ;;  %v901_v8 = vpop.f32.mrf.mxu0 }
 0x17f   : > { %v915_v9 = vpop.f32.mrf.mxu1 }
 0x180   : > { %v916_v10 = vadd.f32 %v915_v9, %v901_v8 }
 0x182   : > { %v919_v11 = vadd.f32 %v916_v10, %v759_v58 }
 0x184   : > { %921 = vst [vmem:[#allocation2 + $0x8] sm:$0xff] %v919_v11 }
 0x185 PF: > { %p922_p9 = scmp.eq.s32.totalorder %s1446_s27, 3 }
 0x186   : > { %v927_v12 = vld [vmem:[#allocation2] sm:$0xff] (%p922_p9) }
 0x187   : > { %926 = sbr.rel (!%p922_p9) target bundleno = 397 (0x18d), region = 48  ;;  %929 = vst [vmem:[#allocation6] sm:$0xff] (%p922_p9), %v927_v12 }
 0x18b   : > { %v928_v13 = vld [vmem:[#allocation2 + $0x8] sm:$0xff] (%p922_p9) }
 0x18c   : > { %930 = vst [vmem:[#allocation6 + $0x8] sm:$0xff] %v928_v13 }
 0x18d PF: > { %p1337_p10 = scmp.eq.s32.totalorder %s1061_s0, 3  ;;  %s941_s26 = sshll.u32 %s1674_s6, 4  ;;  %s942_s26 = int_to_ptr.hbm [resolvable:$true] %s941_s26 }
 0x18e   : > { %s1459_s30 = smov [#allocation6]   ;;  %s1460_s8 = smov 128  }
 0x18f   : > { %s939_s7 = sshll.u32 %s1459_s30, 4  ;;  %s1461_s9 = smov 8   ;;  %s940_s7 = int_to_ptr.vmem [resolvable:$true] %s939_s7 }
 0x190   : > { %1334 = dma.vmem_to_hbm [thread:$0]  (%p1337_p10), %s940_s7, 256, %s942_s26, [#allocation7], %s1460_s8, %s1460_s8, %s1461_s9  }
 0x191   : > { %1441 = dma.done.wait (%p1337_p10), [#allocation7], 256  }
 0x192   : > { %1443 = vsyncadd (%p1337_p10), [#allocation7], 4294967040 }
 0x193 PF: > { %s26_s29 = sadd.s32 1, %s1454_s29   ;;  %s1677_s27 = smov %s1450_s28 }
 0x194   : > { %p23_p11 = scmp.ge.s32.totalorder %s26_s29, 6   ;;  %s1678_s28 = smov %s1680_s1 }
 0x196   :  { %25 = sbr.rel (!%p23_p11) target bundleno = 8 (0x8), region = 85 }
 0x19b   :  { %958 = vsyncpa [#allocation7], 1 }
 0x19c   :  { %960 = vsyncpa [#allocation7 + $0x1], 1 }

</bundles_post_ra>
